<compile_context>
chip_gen: v7x
topology: tpu7x:2x2x1
jax: 0.10.0
libtpu: 0.0.40
codegen_flags: <defaults>
</compile_context>

<pallas_src>
import numpy as np
import jax
import jax.numpy as jnp
from jax.experimental import pallas as pl
from jax.experimental.pallas import tpu as pltpu


# ----------------------------- kernels ---------------------------------------

def _cos_kernel_rowmajor(t_ref, w_ref, o_ref):
    # t_ref: (TN, 1) f32, w_ref: (1, D) f32, o_ref: (TN, D)
    # D is a multiple of 128 -> lane-dense, single unmasked full-block store.
    o_ref[...] = jnp.cos(t_ref[...] * w_ref[...]).astype(o_ref.dtype)


def _cos_kernel_transposed(t_ref, w_ref, o_ref):
    # t_ref: (1, TN) f32, w_ref: (D, 1) f32, o_ref: (D, TN)
    # N sits on the lane axis (TN multiple of 128) -> lane-dense stores even
    # when D < 128.  Single full-block store.
    o_ref[...] = jnp.cos(w_ref[...] * t_ref[...]).astype(o_ref.dtype)


# ----------------------------- wrapper ----------------------------------------

def _fixed_time_freqs(dim, alpha=10):
    # Matches the PyTorch parameter construction (float32 throughout).
    exps = np.linspace(0, alpha - 1, dim, dtype=np.float32)
    return jnp.asarray((1.0 / (alpha ** exps)).astype(np.float32))


def _round_up(x, m):
    return ((x + m - 1) // m) * m


def fixed_time_encode(t, dim, alpha=10, *, out_dtype=jnp.float32,
                      vmem_budget_bytes=8 * 1024 * 1024):
    """JAX/Pallas equivalent of FixedTimeEncode(dim, alpha).forward(t).

    Returns an array of shape (t.size, dim) in `out_dtype` (float32 default).
    """
    freqs = _fixed_time_freqs(dim, alpha)                 # (dim,) f32
    t_flat = jnp.asarray(t, dtype=jnp.float32).reshape(-1)
    n = t_flat.shape[0]

    out_bytes = np.dtype(out_dtype).itemsize
    row_major = (dim % 128 == 0)
    gran = 8 if row_major else 128                        # tile granularity

    # Size the row tile so the double-buffered output block stays within a
    # conservative VMEM budget (fits v5e's 16 MiB / v7x's 32 MiB scoped
    # defaults with room to spare), capped at 1024 rows (pipeline knee).
    cap = vmem_budget_bytes // (2 * dim * out_bytes)
    cap = max(gran, (cap // gran) * gran)
    tile = min(1024, cap)
    tile = min(tile, _round_up(n, gran))                  # don't over-pad tiny N
    tile = max(gran, (tile // gran) * gran)

    n_pad = _round_up(n, tile)
    grid = (n_pad // tile,)
    cparams = pltpu.CompilerParams(dimension_semantics=("parallel",))

    if row_major:
        # (tile, dim) output blocks: dim >= 128 and lane-dense already.
        t_in = jnp.zeros((n_pad, 1), dtype=jnp.float32).at[:n, 0].set(t_flat)
        w_in = freqs.reshape(1, dim)
        out = pl.pallas_call(
            _cos_kernel_rowmajor,
            out_shape=jax.ShapeDtypeStruct((n_pad, dim), out_dtype),
            grid_spec=pltpu.PrefetchScalarGridSpec(
                num_scalar_prefetch=0,
                grid=grid,
                in_specs=[
                    pl.BlockSpec((tile, 1), lambda i: (i, 0)),   # t column tile
                    pl.BlockSpec((1, dim), lambda i: (0, 0)),    # freqs (resident)
                ],
                out_specs=pl.BlockSpec((tile, dim), lambda i: (i, 0)),
            ),
            compiler_params=cparams,
        )(t_in, w_in)
        return out[:n]

    # dim < 128 (or not 128-aligned): put N on the lane axis instead.
    t_in = jnp.zeros((1, n_pad), dtype=jnp.float32).at[0, :n].set(t_flat)   # lane-dense t
    w_in = freqs.reshape(dim, 1)
    out = pl.pallas_call(
        _cos_kernel_transposed,
        out_shape=jax.ShapeDtypeStruct((dim, n_pad), out_dtype),
        grid_spec=pltpu.PrefetchScalarGridSpec(
            num_scalar_prefetch=0,
            grid=grid,
            in_specs=[
                pl.BlockSpec((1, tile), lambda i: (0, i)),       # t row tile
                pl.BlockSpec((dim, 1), lambda i: (0, 0)),        # freqs (resident)
            ],
            out_specs=pl.BlockSpec((dim, tile), lambda i: (0, i)),
        ),
        compiler_params=cparams,
    )(t_in, w_in)
    # Transpose back to (N, dim): layout plumbing outside the kernel.
    return out[:, :n].T


# ----------------------------- reference & test --------------------------------

def _reference(t, dim, alpha=10):
    freqs = _fixed_time_freqs(dim, alpha)
    phase = jnp.asarray(t, jnp.float32).reshape(-1, 1) * freqs.reshape(1, dim)
    return jnp.cos(phase)


if __name__ == "__main__":
    key = jax.random.PRNGKey(0)
    # Batch of timestamps: batch=2, seq=16 -> 32 scalar times.
    t = jax.random.uniform(key, (2, 16), dtype=jnp.float32) * 1000.0

    # Small dim (< 128) exercises the transposed, lane-dense-N path.
    dim_small = 32
    out_s = jax.block_until_ready(fixed_time_encode(t, dim_small))
    ref_s = _reference(t, dim_small)
    assert out_s.shape == (t.size, dim_small)
    assert jnp.allclose(out_s, ref_s, atol=1e-5, rtol=1e-5), "mismatch (dim=32)"

    # dim multiple of 128 exercises the row-major lane-dense path.
    dim_big = 128
    out_b = jax.block_until_ready(fixed_time_encode(t, dim_big))
    ref_b = _reference(t, dim_big)
    assert out_b.shape == (t.size, dim_big)
    assert jnp.allclose(out_b, ref_b, atol=1e-5, rtol=1e-5), "mismatch (dim=128)"

    print("KERNEL_OK")
</pallas_src>

<mosaic_0001>
module attributes {stable_mosaic.version = 11 : i64} {
  func.func @_cos_kernel_transposed(%arg0: i32, %arg1: memref<1x128xf32, #tpu.memory_space<vmem>>, %arg2: memref<32x1xf32, #tpu.memory_space<vmem>>, %arg3: memref<32x128xf32, #tpu.memory_space<vmem>>) attributes {dimension_semantics = [#tpu.dimension_semantics<parallel>], iteration_bounds = array<i64: 1>, scalar_prefetch = 0 : i64, scratch_operands = 0 : i64, tpu.core_type = #tpu.core_type<tc>, window_params = [{transform_indices = @transform_0, window_bounds = array<i64: 1, 128>}, {pipeline_mode = #tpu.pipeline_mode<synchronous>, transform_indices = @transform_1, window_bounds = array<i64: 32, 1>}, {transform_indices = @transform_2, window_bounds = array<i64: 32, 128>}]} {
    %c0 = arith.constant 0 : index
    %c0_0 = arith.constant 0 : index
    %0 = vector.load %arg2[%c0, %c0_0] : memref<32x1xf32, #tpu.memory_space<vmem>>, vector<32x1xf32>
    %c0_1 = arith.constant 0 : index
    %c0_2 = arith.constant 0 : index
    %1 = vector.load %arg1[%c0_1, %c0_2] : memref<1x128xf32, #tpu.memory_space<vmem>>, vector<1x128xf32>
    %2 = vector.broadcast %0 : vector<32x1xf32> to vector<32x128xf32>
    %3 = vector.broadcast %1 : vector<1x128xf32> to vector<32x128xf32>
    %4 = arith.mulf %2, %3 : vector<32x128xf32>
    %5 = math.cos %4 : vector<32x128xf32>
    %c0_3 = arith.constant 0 : index
    %c0_4 = arith.constant 0 : index
    %6 = vector.load %arg3[%c0_3, %c0_4] : memref<32x128xf32, #tpu.memory_space<vmem>>, vector<32x128xf32>
    tpu.vector_store %arg3[%c0_3, %c0_4], %5 {strides = array<i32>} : memref<32x128xf32, #tpu.memory_space<vmem>>, vector<32x128xf32>,
    return
  }
  func.func @transform_0(%arg0: i32) -> (i32, i32) {
    %c0_i32 = arith.constant 0 : i32
    %c0_i32_0 = arith.constant 0 : i32
    return %c0_i32, %arg0 : i32, i32
  }
  func.func @transform_1(%arg0: i32) -> (i32, i32) {
    %c0_i32 = arith.constant 0 : i32
    %c0_i32_0 = arith.constant 0 : i32
    %c0_i32_1 = arith.constant 0 : i32
    return %c0_i32, %c0_i32_0 : i32, i32
  }
  func.func @transform_2(%arg0: i32) -> (i32, i32) {
    %c0_i32 = arith.constant 0 : i32
    %c0_i32_0 = arith.constant 0 : i32
    return %c0_i32, %arg0 : i32, i32
  }
}

</mosaic_0001>

<bundles_post_ra>
// kernel: tpu_custom_call.1
= control target key start
LH: loop header
LB: loop body
LE: loop exit
PB: predicated region body
PF: predicated region fallthrough
CT: control target
= control target key end

     0   :  { %v564_v2 = vmov 0   ;;  %s914_s0 = inlined_call_operand.vmem [shape: f32[1,128], index: 0, kind: input, shape index: {}]   ;;  %s915_s1 = inlined_call_operand.vmem [shape: f32[32,1], index: 1, kind: input, shape index: {}]   ;;  %s916_s2 = inlined_call_operand.hbm [shape: f32[32,128], index: 2, kind: output, shape index: {}]  }
   0x1   :  { %v14_v0 = vld [vmem:[%s915_s1 + $0x10] sm:$0xff]  ;;  %v12_v1 = vld [vmem:[%s915_s1] sm:$0xff]  ;;  %523 = vset.pattern.permute.xlu1 %v564_v2  ;;  %522 = vset.pattern.permute.xlu0 %v564_v2  ;;  %v15_v3 = vld [vmem:[%s915_s1 + $0x18] sm:$0xff] }
   0x2   :  { %29 = vperm.xlu1 %523, %v14_v0   ;;  %19 = vperm.xlu0 %522, %v12_v1   ;;  %v13_v4 = vld [vmem:[%s915_s1 + $0x8] sm:$0xff] }
   0x3   :  { %7 = vsyncpa [#allocation3], 0  ;;  %v479_v5 = vld [vmem:[%s914_s0] ss:$0 sm:$0xff]  ;;  %v565_v40 = vmov 683565275  }
   0x4   :  { %v566_v44 = vmov 2475754826   ;;  %v567_v46 = vmov 2131351028   ;;  %v568_v48 = vmov 2102212464  }
   0x5   :  { %v569_v50 = vmov 920167782   ;;  %v570_v57 = vmov 1326507024   ;;  %s571_s0 = smov [#allocation2]  }
   0x6   :  { %34 = vperm.xlu1 %523, %v15_v3   ;;  %24 = vperm.xlu0 %522, %v13_v4   ;;  %s468_s1 = sshll.u32 %s571_s0, 4  ;;  %s469_s1 = int_to_ptr.vmem [resolvable:$true] %s468_s1 }
   0x7   :  { %s540_s19 = scalar_lea.vmem %s469_s1, 512  ;;  %p545_p1 = scmp.lt.s32.totalorder %s469_s1, %s469_s1 }
   0x8   :  { %p541_p0 = scmp.ne.s32.totalorder %s469_s1, %s540_s19  ;;  %p546_p2 = scmp.lt.s32.totalorder %s540_s19, %s540_s19 }
   0xa   :  { %p547_p3 = por %p546_p2, %p545_p1 }
   0xc   :  { %p548_p4 = pnand %p547_p3, %p541_p0 }
  0x81   :  { %v30_v6 = vpop.permute.xlu1 %29  ;;  %v20_v7 = vpop.permute.xlu0 %19 }
  0x82   :  { %v604_v8 = vmul.f32 %v479_v5, %v30_v6  ;;  %v606_v9 = vmul.f32 %v479_v5, %v20_v7 }
  0x84   :  { %v253_v10 = vand.u32 2147483647, %v604_v8  ;;  %v256_v11 = vand.u32 2139095040, %v604_v8  ;;  %v47_v12 = vand.u32 2147483647, %v606_v9  ;;  %v50_v13 = vand.u32 2139095040, %v606_v9 }
  0x85   :  { %v35_v14 = vpop.permute.xlu1 %34  ;;  %v25_v28 = vpop.permute.xlu0 %24  ;;  %vm255_vm13 = vcmp.lt.s32.totalorder %v604_v8, 0 }
  0x86   :  { %v257_v15 = vshrl.u32 %v256_v11, 23  ;;  %v612_v16 = vmul.f32 %v479_v5, %v35_v14  ;;  %v260_v17 = vand.u32 8388607, %v253_v10  ;;  %v51_v18 = vshrl.u32 %v50_v13, 23 }
  0x87   :  { %v54_v19 = vand.u32 8388607, %v47_v12  ;;  %v619_v34 = vmul.f32 %v479_v5, %v25_v28 }
  0x88   :  { %v488_v20 = vadd.s32 4294967169, %v257_v15  ;;  %v480_v21 = vadd.s32 4294967169, %v51_v18  ;;  %v359_v22 = vand.u32 2139095040, %v612_v16  ;;  %v261_v24 = vor.u32 8388608, %v260_v17 }
  0x89   :  { %v55_v25 = vor.u32 8388608, %v54_v19  ;;  %v356_v38 = vand.u32 2147483647, %v612_v16 }
  0x8a   :  { %v263_v23 = vadd.s32 1, %v488_v20  ;;  %v57_v26 = vadd.s32 1, %v480_v21  ;;  %v360_v27 = vshrl.u32 %v359_v22, 23  ;;  %v621_v35 = vshll.u32 %v261_v24, 8 }
  0x8b   :  { %v625_v37 = vshll.u32 %v55_v25, 8 }
  0x8c   :  { %vm264_vm0 = vcmp.gt.s32.totalorder %v263_v23, 0  ;;  %vm58_vm1 = vcmp.gt.s32.totalorder %v57_v26, 0  ;;  %v492_v30 = vadd.s32 4294967169, %v360_v27 }
  0x8d   :  { %v265_v29 = vsel %vm264_vm0, %v263_v23, 0  ;;  %v59_v33 = vsel %vm58_vm1, %v57_v26, 0 }
  0x8e   :  { %v266_v31 = vshrl.u32 %v265_v29, 5  ;;  %v267_v32 = vand.u32 31, %v265_v29  ;;  %v623_v36 = vshrl.u32 %v59_v33, 5  ;;  %v61_v42 = vand.u32 31, %v59_v33 }
  0x8f   :  { %v629_v43 = vadd.s32 1, %v492_v30 }
  0x90   :  { %v268_v39 = vsub.s32 32, %v267_v32  ;;  %v270_v41 = vshll.u32 %v565_v40, %v267_v32  ;;  %v273_v45 = vshll.u32 %v566_v44, %v267_v32  ;;  %v276_v47 = vshll.u32 %v567_v46, %v267_v32 }
  0x91   :  { %v279_v49 = vshll.u32 %v568_v48, %v267_v32  ;;  %v282_v51 = vshll.u32 %v569_v50, %v267_v32  ;;  %vm285_vm2 = vcmp.lt.s32.totalorder %v266_v31, 1  ;;  %vm286_vm3 = vcmp.lt.s32.totalorder %v266_v31, 2 }
  0x92   :  { %v271_v52 = vshrl.u32 %v566_v44, %v268_v39  ;;  %v274_v53 = vshrl.u32 %v567_v46, %v268_v39  ;;  %v277_v54 = vshrl.u32 %v568_v48, %v268_v39  ;;  %v269_v55 = vshrl.u32 %v565_v40, %v268_v39 }
  0x93   :  { %v280_v56 = vshrl.u32 %v569_v50, %v268_v39  ;;  %v283_v58 = vshrl.u32 %v570_v57, %v268_v39  ;;  %v62_v62 = vsub.s32 32, %v61_v42  ;;  %vm287_vm4 = vcmp.lt.s32.totalorder %v266_v31, 3 }
  0x94   :  { %v272_v59 = vor.u32 %v271_v52, %v270_v41  ;;  %v275_v60 = vor.u32 %v274_v53, %v273_v45  ;;  %v278_v61 = vor.u32 %v277_v54, %v276_v47  ;;  %vm288_vm5 = vcmp.lt.s32.totalorder %v266_v31, 4 }
  0x95   :  { %v281_v63 = vor.u32 %v280_v56, %v279_v49  ;;  %v284_v0 = vor.u32 %v283_v58, %v282_v51  ;;  %v64_v11 = vshll.u32 %v565_v40, %v61_v42  ;;  %v65_v15 = vshrl.u32 %v566_v44, %v62_v62 }
  0x96   :  { %v289_v1 = vsel %vm285_vm2, %v269_v55, %v272_v59  ;;  %v290_v2 = vsel %vm288_vm5, %v278_v61, 2102212464  ;;  %v293_v3 = vsel %vm285_vm2, %v272_v59, %v275_v60  ;;  %v297_v4 = vsel %vm285_vm2, %v275_v60, %v278_v61 }
  0x97   :  { %v291_v5 = vsel %vm287_vm4, %v275_v60, %v290_v2  ;;  %v294_v6 = vsel %vm288_vm5, %v281_v63, 920167782  ;;  %v298_v7 = vsel %vm288_vm5, %v284_v0, 1326507024  ;;  %v67_v17 = vshll.u32 %v566_v44, %v61_v42 }
  0x98   :  { %v295_v13 = vsel %vm287_vm4, %v278_v61, %v294_v6  ;;  %v299_v14 = vsel %vm287_vm4, %v281_v63, %v298_v7  ;;  %v292_v18 = vsel %vm286_vm3, %v289_v1, %v291_v5  ;;  %v68_v21 = vshrl.u32 %v567_v46, %v62_v62 }
  0x99   :  { %v296_v19 = vsel %vm286_vm3, %v293_v3, %v295_v13  ;;  %v300_v20 = vsel %vm286_vm3, %v297_v4, %v299_v14  ;;  %v66_v26 = vor.u32 %v65_v15, %v64_v11  ;;  %v70_v28 = vshll.u32 %v567_v46, %v61_v42 }
  0x9a   :  { %v652_v22 = vmul.u32.u64.low %v621_v35, %v300_v20  ;;  %v653_v23 = vmul.u32.u64.high %v621_v35, %v300_v20, %v652_v22  ;;  %v656_v24 = vmul.u32.u64.low %v621_v35, %v296_v19  ;;  %v657_v25 = vmul.u32.u64.high %v621_v35, %v296_v19, %v656_v24 }
  0x9b   :  { %v69_v27 = vor.u32 %v68_v21, %v67_v17  ;;  %v71_v29 = vshrl.u32 %v568_v48, %v62_v62  ;;  %v63_v30 = vshrl.u32 %v565_v40, %v62_v62  ;;  %v73_v31 = vshll.u32 %v568_v48, %v61_v42 }
  0x9c   :  { %v74_v32 = vshrl.u32 %v569_v50, %v62_v62  ;;  %v77_v33 = vshrl.u32 %v570_v57, %v62_v62  ;;  %v308_v39 = vmul.u32 %v621_v35, %v292_v18  ;;  %v76_v45 = vshll.u32 %v569_v50, %v61_v42 }
  0x9d   :  { %v72_v41 = vor.u32 %v71_v29, %v70_v28  ;;  %vm79_vm6 = vcmp.lt.s32.totalorder %v623_v36, 1  ;;  %vm310_vm7 = vc.u32 %v653_v23, %v656_v24  ;;  %v311_v47 = vadd.s32 1, %v657_v25 }
  0x9e   :  { %v75_v49 = vor.u32 %v74_v32, %v73_v31  ;;  %vm80_vm8 = vcmp.lt.s32.totalorder %v623_v36, 2  ;;  %v78_v51 = vor.u32 %v77_v33, %v76_v45  ;;  %vm81_vm9 = vcmp.lt.s32.totalorder %v623_v36, 3 }
  0x9f   :  { %vm82_vm10 = vcmp.lt.s32.totalorder %v623_v36, 4  ;;  %v87_v52 = vsel %vm79_vm6, %v66_v26, %v69_v27  ;;  %v312_v35 = vsel %vm310_vm7, %v311_v47, %v657_v25  ;;  %v91_v54 = vsel %vm79_vm6, %v69_v27, %v72_v41 }
  0xa0   :  { %v84_v53 = vsel %vm82_vm10, %v72_v41, 2102212464  ;;  %v88_v42 = vsel %vm82_vm10, %v75_v49, 920167782  ;;  %v313_v55 = vadd.s32 %v312_v35, %v308_v39  ;;  %v83_v56 = vsel %vm79_vm6, %v63_v30, %v66_v26 }
  0xa1   :  { %v89_v58 = vsel %vm81_vm9, %v72_v41, %v88_v42  ;;  %v92_v59 = vsel %vm82_vm10, %v78_v51, 1326507024  ;;  %v85_v60 = vsel %vm81_vm9, %v69_v27, %v84_v53  ;;  %vm367_vm11 = vcmp.gt.s32.totalorder %v629_v43, 0 }
  0xa2   :  { %v90_v61 = vsel %vm80_vm8, %v87_v52, %v89_v58  ;;  %v93_v62 = vsel %vm81_vm9, %v75_v49, %v92_v59  ;;  %v314_v63 = vadd.s32 536870912, %v313_v55  ;;  %v363_v5 = vand.u32 8388607, %v356_v38 }
  0xa3   :  { %v94_v0 = vsel %vm80_vm8, %v91_v54, %v93_v62  ;;  %v682_v1 = vmul.u32.u64.low %v625_v37, %v90_v61  ;;  %v683_v2 = vmul.u32.u64.high %v625_v37, %v90_v61, %v682_v1  ;;  %v368_v6 = vsel %vm367_vm11, %v629_v43, 0 }
  0xa4   :  { %v687_v3 = vmul.u32.u64.low %v625_v37, %v94_v0  ;;  %v688_v4 = vmul.u32.u64.high %v625_v37, %v94_v0, %v687_v3  ;;  %v693_v7 = vshrl.u32 %v314_v63, 30  ;;  %v86_v11 = vsel %vm80_vm8, %v83_v56, %v85_v60 }
  0xa5   :  { %v370_v13 = vand.u32 31, %v368_v6  ;;  %v105_v15 = vadd.s32 1, %v683_v2  ;;  %v102_v18 = vmul.u32 %v625_v37, %v86_v11  ;;  %v364_v19 = vor.u32 8388608, %v363_v5 }
  0xa6   :  { %v316_v14 = vshll.u32 %v693_v7, 30  ;;  %vm104_vm12 = vc.u32 %v688_v4, %v682_v1  ;;  %v153_v20 = vand.u32 2139095040, %v619_v34  ;;  %v150_v26 = vand.u32 2147483647, %v619_v34 }
  0xa7   :  { %v371_v17 = vsub.s32 32, %v370_v13  ;;  %v106_v21 = vsel %vm104_vm12, %v105_v15, %v683_v2  ;;  %v707_v29 = vshll.u32 %v364_v19, 8  ;;  %v709_v31 = vshrl.u32 %v368_v6, 5 }
  0xa8   :  { %v317_v43 = vsub.s32 %v313_v55, %v316_v14  ;;  %v107_v22 = vadd.s32 %v106_v21, %v102_v18  ;;  %v154_v37 = vshrl.u32 %v153_v20, 23  ;;  %v373_v32 = vshll.u32 %v565_v40, %v370_v13 }
  0xa9   :  { %v374_v25 = vshrl.u32 %v566_v44, %v371_v17  ;;  %v377_v28 = vshrl.u32 %v567_v46, %v371_v17  ;;  %v380_v33 = vshrl.u32 %v568_v48, %v371_v17  ;;  %v376_v41 = vshll.u32 %v566_v44, %v370_v13 }
  0xaa   :  { %v319_v36 = vsub.s32 0, %v317_v43  ;;  %v108_v27 = vadd.s32 536870912, %v107_v22  ;;  %v382_v45 = vshll.u32 %v568_v48, %v370_v13  ;;  %v383_v47 = vshrl.u32 %v569_v50, %v371_v17 }
  0xab   :  { %v309_v49 = vadd.s32 %v656_v24, %v653_v23  ;;  %v375_v52 = vor.u32 %v374_v25, %v373_v32  ;;  %v379_v35 = vshll.u32 %v567_v46, %v370_v13  ;;  %v378_v42 = vor.u32 %v377_v28, %v376_v41 }
  0xac   :  { %v489_v30 = vmin.u32 %v319_v36, %v317_v43  ;;  %v713_v39 = vshrl.u32 %v108_v27, 30  ;;  %v384_v54 = vor.u32 %v383_v47, %v382_v45  ;;  %v386_v55 = vshrl.u32 %v570_v57, %v371_v17 }
  0xad   :  { %v339_v58 = vsub.s32 4, %v693_v7  ;;  %v381_v59 = vor.u32 %v380_v33, %v379_v35  ;;  %v484_v60 = vadd.s32 4294967169, %v154_v37  ;;  %v372_v23 = vshrl.u32 %v565_v40, %v371_v17 }
  0xae   :  { %v321_v51 = vclz %v489_v30  ;;  %v110_v53 = vshll.u32 %v713_v39, 30  ;;  %v385_v24 = vshll.u32 %v569_v50, %v370_v13  ;;  %vm391_vm14 = vcmp.lt.s32.totalorder %v709_v31, 4 }
  0xaf   :  { %vm388_vm0 = vcmp.lt.s32.totalorder %v709_v31, 1  ;;  %vm390_vm1 = vcmp.lt.s32.totalorder %v709_v31, 3  ;;  %v397_v62 = vsel %vm391_vm14, %v384_v54, 920167782  ;;  %vm739_vm2 = vcmp.le.f32.partialorder %v253_v10, 0.7853982 }
  0xb0   :  { %v490_v56 = vadd.s32 4294967294, %v321_v51  ;;  %v725_v61 = vsub.s32 %v107_v22, %v110_v53  ;;  %v387_v2 = vor.u32 %v386_v55, %v385_v24  ;;  %v396_v3 = vsel %vm388_vm0, %v375_v52, %v378_v42 }
  0xb1   :  { %vm389_vm3 = vcmp.lt.s32.totalorder %v709_v31, 2  ;;  %v398_v13 = vsel %vm390_vm1, %v381_v59, %v397_v62  ;;  %v392_v17 = vsel %vm388_vm0, %v372_v23, %v375_v52  ;;  %v393_v18 = vsel %vm391_vm14, %v381_v59, 2102212464 }
  0xb2   :  { %vm491_vm15 = vcmp.lt.s32.totalorder %v490_v56, 0  ;;  %v113_v0 = vsub.s32 0, %v725_v61  ;;  %v399_v20 = vsel %vm389_vm3, %v396_v3, %v398_v13  ;;  %v400_v21 = vsel %vm388_vm0, %v378_v42, %v381_v59 }
  0xb3   :  { %v324_v63 = vsel %vm491_vm15, 0, %v490_v56  ;;  %v758_v36 = vmul.u32.u64.low %v707_v29, %v399_v20  ;;  %v759_v25 = vmul.u32.u64.high %v707_v29, %v399_v20, %v758_v36  ;;  %v394_v37 = vsel %vm390_vm1, %v378_v42, %v393_v18 }
  0xb4   :  { %v325_v6 = vsub.s32 32, %v324_v63  ;;  %v329_v11 = vsub.s32 4294967266, %v324_v63  ;;  %v326_v14 = vshll.u32 %v317_v43, %v324_v63  ;;  %v481_v15 = vmin.u32 %v113_v0, %v725_v61 }
  0xb5   :  { %v401_v43 = vsel %vm391_vm14, %v387_v2, 1326507024  ;;  %v770_v41 = vand.u32 8388607, %v150_v26  ;;  %v160_v45 = vadd.s32 1, %v484_v60  ;;  %v395_v35 = vsel %vm389_vm3, %v392_v17, %v394_v37 }
  0xb6   :  { %v327_v10 = vshrl.u32 %v309_v49, %v325_v6  ;;  %v330_v19 = vadd.s32 127, %v329_v11  ;;  %v115_v22 = vclz %v481_v15  ;;  %v402_v30 = vsel %vm390_vm1, %v384_v54, %v401_v43 }
  0xb7   :  { %v403_v33 = vsel %vm389_vm3, %v400_v21, %v402_v30  ;;  %v340_v49 = vsel %vm255_vm13, %v339_v58, %v693_v7  ;;  %v414_v53 = vadd.s32 1, %v759_v25  ;;  %vm161_vm5 = vcmp.gt.s32.totalorder %v160_v45, 0 }
  0xb8   :  { %v328_v27 = vor.u32 %v327_v10, %v326_v14  ;;  %v331_v28 = vshll.u32 %v330_v19, 23  ;;  %v482_v32 = vadd.s32 4294967294, %v115_v22  ;;  %v162_v56 = vsel %vm161_vm5, %v160_v45, 0 }
  0xb9   :  { %v776_v51 = vmul.u32.u64.low %v707_v29, %v403_v33  ;;  %v777_v52 = vmul.u32.u64.high %v707_v29, %v403_v33, %v776_v51  ;;  %v342_v59 = vsel %vm739_vm2, 0, %v340_v49  ;;  %v103_v7 = vadd.s32 %v682_v1, %v688_v4 }
  0xba   :  { %v332_v47 = vor.u32 4788187, %v331_v28  ;;  %vm483_vm4 = vcmp.lt.s32.totalorder %v482_v32, 0  ;;  %v335_v54 = vcvt.s32.f32 %v328_v27  ;;  %v411_v24 = vmul.u32 %v707_v29, %v395_v35 }
  0xbb   :  { %v118_v55 = vsel %vm483_vm4, 0, %v482_v32  ;;  %vm413_vm6 = vc.u32 %v777_v52, %v758_v36  ;;  %v164_v31 = vand.u32 31, %v162_v56  ;;  %vm49_vm7 = vcmp.lt.s32.totalorder %v606_v9, 0 }
  0xbc   :  { %v333_v42 = vand.u32 2147483647, %v332_v47  ;;  %v119_v58 = vsub.s32 32, %v118_v55  ;;  %v123_v60 = vsub.s32 4294967266, %v118_v55  ;;  %v120_v62 = vshll.u32 %v725_v61, %v118_v55 }
  0xbd   :  { %v415_v2 = vsel %vm413_vm6, %v414_v53, %v759_v25  ;;  %v792_v6 = vand.u32 3, %v342_v59  ;;  %v165_v4 = vsub.s32 32, %v164_v31  ;;  %v133_v29 = vsub.s32 4, %v713_v39 }
  0xbe   :  { %v336_v23 = vmul.f32 %v335_v54, %v333_v42  ;;  %v121_v63 = vshrl.u32 %v103_v7, %v119_v58  ;;  %v124_v0 = vadd.s32 127, %v123_v60  ;;  %v416_v1 = vadd.s32 %v415_v2, %v411_v24 }
  0xbf   :  { %v158_v14 = vor.u32 8388608, %v770_v41  ;;  %v798_v61 = vshrl.u32 %v162_v56, 5  ;;  %v167_v18 = vshll.u32 %v565_v40, %v164_v31  ;;  %v168_v20 = vshrl.u32 %v566_v44, %v165_v4 }
  0xc0   :  { %v337_v3 = vxor.u32 2147483648, %v336_v23  ;;  %v122_v11 = vor.u32 %v121_v63, %v120_v62  ;;  %v125_v13 = vshll.u32 %v124_v0, 23  ;;  %v417_v17 = vadd.s32 536870912, %v416_v1 }
  0xc1   :  { %v171_v21 = vshrl.u32 %v567_v46, %v165_v4  ;;  %v173_v43 = vshll.u32 %v567_v46, %v164_v31  ;;  %v174_v25 = vshrl.u32 %v568_v48, %v165_v4  ;;  %v170_v37 = vshll.u32 %v566_v44, %v164_v31 }
  0xc2   :  { %v338_v15 = vsel %vm255_vm13, %v337_v3, %v336_v23  ;;  %v126_v19 = vor.u32 4788187, %v125_v13  ;;  %v806_v22 = vshrl.u32 %v417_v17, 30  ;;  %v129_v28 = vcvt.s32.f32 %v122_v11 }
  0xc3   :  { %v341_v10 = vsel %vm739_vm2, %v604_v8, %v338_v15  ;;  %v175_v30 = vor.u32 %v174_v25, %v173_v43  ;;  %v176_v32 = vshll.u32 %v568_v48, %v164_v31  ;;  %v177_v33 = vshrl.u32 %v569_v50, %v165_v4 }
  0xc4   :  { %524 = vcosq.f32 %v341_v10  ;;  %v127_v27 = vand.u32 2147483647, %v126_v19  ;;  %v419_v5 = vshll.u32 %v806_v22, 30  ;;  %v169_v45 = vor.u32 %v168_v20, %v167_v18 }
  0xc5   :  { %526 = vsinq.f32 %v341_v10  ;;  %v172_v47 = vor.u32 %v171_v21, %v170_v37  ;;  %v180_v49 = vshrl.u32 %v570_v57, %v165_v4  ;;  %vm817_vm8 = vcmp.le.f32.partialorder %v47_v12, 0.7853982 }
  0xc6   :  { %v130_v41 = vmul.f32 %v129_v28, %v127_v27  ;;  %v134_v44 = vsel %vm49_vm7, %v133_v29, %v713_v39  ;;  %v824_v51 = vsub.s32 %v416_v1, %v419_v5  ;;  %v178_v48 = vor.u32 %v177_v33, %v176_v32 }
  0xc7   :  { %vm348_vm9 = vcmp.eq.s32.totalorder %v792_v6, 0  ;;  %v179_v53 = vshll.u32 %v569_v50, %v164_v31  ;;  %vm185_vm10 = vcmp.lt.s32.totalorder %v798_v61, 4  ;;  %v198_v57 = vshll.u32 %v158_v14, 8 }
  0xc8   :  { %v131_v35 = vxor.u32 2147483648, %v130_v41  ;;  %vm347_vm11 = vcmp.lt.s32.totalorder %v792_v6, 2  ;;  %v422_v12 = vsub.s32 0, %v824_v51  ;;  %v166_v42 = vshrl.u32 %v565_v40, %v165_v4 }
  0xc9   :  { %vm182_vm12 = vcmp.lt.s32.totalorder %v798_v61, 1  ;;  %v187_v39 = vsel %vm185_vm10, %v175_v30, 2102212464  ;;  %v181_v55 = vor.u32 %v180_v49, %v179_v53  ;;  %v191_v56 = vsel %vm185_vm10, %v178_v48, 920167782 }
  0xca   :  { %v132_v54 = vsel %vm49_vm7, %v131_v35, %v130_v41  ;;  %v190_v50 = vsel %vm182_vm12, %v169_v45, %v172_v47  ;;  %v493_v40 = vmin.u32 %v422_v12, %v824_v51  ;;  %vm183_vm13 = vcmp.lt.s32.totalorder %v798_v61, 2 }
  0xcb   :  { %v135_v59 = vsel %vm817_vm8, %v606_v9, %v132_v54  ;;  %vm184_vm14 = vcmp.lt.s32.totalorder %v798_v61, 3  ;;  %v186_v7 = vsel %vm182_vm12, %v166_v42, %v169_v45  ;;  %v194_v62 = vsel %vm182_vm12, %v172_v47, %v175_v30 }
  0xcc   :  { %528 = vcosq.f32 %v135_v59  ;;  %v188_v58 = vsel %vm184_vm14, %v172_v47, %v187_v39  ;;  %v192_v60 = vsel %vm184_vm14, %v175_v30, %v191_v56  ;;  %v424_v24 = vclz %v493_v40 }
  0xcd   :  { %530 = vsinq.f32 %v135_v59  ;;  %v193_v31 = vsel %vm183_vm13, %v190_v50, %v192_v60  ;;  %v195_v2 = vsel %vm185_vm10, %v181_v55, 1326507024  ;;  %vm351_vm15 = vcmp.eq.s32.totalorder %v792_v6, 2 }
  0xce   :  { %v525_v23 = vpop.eup %524  ;;  %v859_v3 = vmul.u32.u64.low %v198_v57, %v193_v31  ;;  %v860_v1 = vmul.u32.u64.high %v198_v57, %v193_v31, %v859_v3  ;;  %v494_v11 = vadd.s32 4294967294, %v424_v24  ;;  %v196_v13 = vsel %vm184_vm14, %v178_v48, %v195_v2 }
  0xcf   :  { %v527_v63 = vpop.eup %526  ;;  %v352_v0 = vxor.u32 2147483648, %v525_v23  ;;  %v136_v14 = vsel %vm817_vm8, 0, %v134_v44  ;;  %v189_v15 = vsel %vm183_vm13, %v186_v7, %v188_v58  ;;  %v197_v17 = vsel %vm183_vm13, %v194_v62, %v196_v13 }
  0xd0   :  { %v349_v4 = vxor.u32 2147483648, %v527_v63  ;;  %vm495_vm0 = vcmp.lt.s32.totalorder %v494_v11, 0  ;;  %v874_v10 = vmul.u32.u64.low %v198_v57, %v197_v17  ;;  %v875_v19 = vmul.u32.u64.high %v198_v57, %v197_v17, %v874_v10 }
  0xd1   :  { %v353_v29 = vsel %vm351_vm15, %v352_v0, %v527_v63  ;;  %vm345_vm1 = vweird.f32 %v604_v8  ;;  %v427_v21 = vsel %vm495_vm0, 0, %v494_v11  ;;  %v208_v43 = vadd.s32 1, %v860_v1 }
  0xd2   :  { %v350_v18 = vsel %vm348_vm9, %v525_v23, %v349_v4  ;;  %v412_v61 = vadd.s32 %v758_v36, %v777_v52  ;;  %v428_v27 = vsub.s32 32, %v427_v21  ;;  %v432_v28 = vsub.s32 4294967266, %v427_v21 }
  0xd3   :  { %v354_v20 = vsel %vm347_vm11, %v350_v18, %v353_v29  ;;  %v140_v37 = vand.u32 3, %v136_v14  ;;  %v205_v5 = vmul.u32 %v198_v57, %v189_v15  ;;  %v429_v30 = vshll.u32 %v824_v51, %v427_v21 }
  0xd4   :  { %v355_v25 = vsel %vm345_vm1, nan, %v354_v20  ;;  %v430_v32 = vshrl.u32 %v412_v61, %v428_v27  ;;  %v433_v33 = vadd.s32 127, %v432_v28  ;;  %vm207_vm2 = vc.u32 %v875_v19, %v859_v3 }
  0xd5   :  { %461 = vst [vmem:[#allocation2 + $0x10] sm:$0xff] %v355_v25  ;;  %v209_v6 = vsel %vm207_vm2, %v208_v43, %v860_v1  ;;  %vm145_vm3 = vcmp.eq.s32.totalorder %v140_v37, 2  ;;  %vm142_vm4 = vcmp.eq.s32.totalorder %v140_v37, 0  ;;  %vm139_vm5 = vweird.f32 %v606_v9 }
  0xd6   :  { %v529_v8 = vpop.eup %528  ;;  %v431_v47 = vor.u32 %v430_v32, %v429_v30  ;;  %v434_v49 = vshll.u32 %v433_v33, 23  ;;  %v210_v36 = vadd.s32 %v209_v6, %v205_v5  ;;  %vm141_vm6 = vcmp.lt.s32.totalorder %v140_v37, 2 }
  0xd7   :  { %v531_v41 = vpop.eup %530  ;;  %v146_v45 = vxor.u32 2147483648, %v529_v8  ;;  %vm358_vm7 = vcmp.lt.s32.totalorder %v612_v16, 0  ;;  %vm357_vm8 = vcmp.le.f32.partialorder %v356_v38, 0.7853982  ;;  %v442_v9 = vsub.s32 4, %v806_v22 }
  0xd8   :  { %v143_v52 = vxor.u32 2147483648, %v531_v41  ;;  %v435_v44 = vor.u32 4788187, %v434_v49  ;;  %v211_v48 = vadd.s32 536870912, %v210_v36  ;;  %v438_v57 = vcvt.s32.f32 %v431_v47 }
  0xd9   :  { %v147_v46 = vsel %vm145_vm3, %v146_v45, %v531_v41  ;;  %v443_v58 = vsel %vm358_vm7, %v442_v9, %v806_v22  ;;  %v206_v38 = vadd.s32 %v859_v3, %v875_v19  ;;  %vm448_vm13 = vweird.f32 %v612_v16 }
  0xda   :  { %v144_v51 = vsel %vm142_vm4, %v529_v8, %v143_v52  ;;  %v436_v53 = vand.u32 2147483647, %v435_v44  ;;  %v212_v12 = vshrl.u32 %v211_v48, 30  ;;  %v445_v24 = vsel %vm357_vm8, 0, %v443_v58 }
  0xdb   :  { %v148_v35 = vsel %vm141_vm6, %v144_v51, %v147_v46  ;;  %v449_v62 = vand.u32 3, %v445_v24  ;;  %vm152_vm14 = vcmp.lt.s32.totalorder %v619_v34, 0  ;;  %vm151_vm15 = vcmp.le.f32.partialorder %v150_v26, 0.7853982 }
  0xdc   :  { %v149_v42 = vsel %vm139_vm5, nan, %v148_v35  ;;  %v439_v39 = vmul.f32 %v438_v57, %v436_v53  ;;  %v213_v54 = vshll.u32 %v212_v12, 30  ;;  %v236_v27 = vsub.s32 4, %v212_v12 }
  0xdd   :  { %459 = vst [vmem:[#allocation2] sm:$0xff] %v149_v42  ;;  %vm454_vm10 = vcmp.eq.s32.totalorder %v449_v62, 2  ;;  %vm451_vm11 = vcmp.eq.s32.totalorder %v449_v62, 0  ;;  %vm450_vm12 = vcmp.lt.s32.totalorder %v449_v62, 2  ;;  %vm242_vm3 = vweird.f32 %v619_v34 }
  0xde   :  { %v440_v55 = vxor.u32 2147483648, %v439_v39  ;;  %v214_v50 = vsub.s32 %v210_v36, %v213_v54  ;;  %v237_v37 = vsel %vm152_vm14, %v236_v27, %v212_v12 }
  0xe0   :  { %v441_v56 = vsel %vm358_vm7, %v440_v55, %v439_v39  ;;  %v216_v59 = vsub.s32 0, %v214_v50 }
  0xe1   :  { %v444_v40 = vsel %vm357_vm8, %v612_v16, %v441_v56  ;;  %v239_v16 = vsel %vm151_vm15, 0, %v237_v37 }
  0xe2   :  { %532 = vcosq.f32 %v444_v40  ;;  %v485_v7 = vmin.u32 %v216_v59, %v214_v50  ;;  %v243_v5 = vand.u32 3, %v239_v16 }
  0xe3   :  { %534 = vsinq.f32 %v444_v40 }
  0xe4   :  { %v218_v60 = vclz %v485_v7  ;;  %vm248_vm0 = vcmp.eq.s32.totalorder %v243_v5, 2  ;;  %vm245_vm1 = vcmp.eq.s32.totalorder %v243_v5, 0  ;;  %vm244_vm2 = vcmp.lt.s32.totalorder %v243_v5, 2 }
  0xe6   :  { %v486_v23 = vadd.s32 4294967294, %v218_v60 }
  0xe8   :  { %vm487_vm9 = vcmp.lt.s32.totalorder %v486_v23, 0 }
  0xe9   :  { %v221_v31 = vsel %vm487_vm9, 0, %v486_v23 }
  0xea   :  { %v222_v63 = vsub.s32 32, %v221_v31  ;;  %v226_v0 = vsub.s32 4294967266, %v221_v31  ;;  %v223_v1 = vshll.u32 %v214_v50, %v221_v31 }
  0xec   :  { %v533_v2 = vpop.eup %532  ;;  %v224_v4 = vshrl.u32 %v206_v38, %v222_v63  ;;  %v227_v11 = vadd.s32 127, %v226_v0 }
  0xed   :  { %v535_v13 = vpop.eup %534  ;;  %v455_v29 = vxor.u32 2147483648, %v533_v2 }
  0xee   :  { %v452_v14 = vxor.u32 2147483648, %v535_v13  ;;  %v225_v22 = vor.u32 %v224_v4, %v223_v1  ;;  %v228_v15 = vshll.u32 %v227_v11, 23 }
  0xef   :  { %v456_v17 = vsel %vm454_vm10, %v455_v29, %v535_v13 }
  0xf0   :  { %v453_v18 = vsel %vm451_vm11, %v533_v2, %v452_v14  ;;  %v229_v10 = vor.u32 4788187, %v228_v15  ;;  %v232_v21 = vcvt.s32.f32 %v225_v22 }
  0xf1   :  { %v457_v3 = vsel %vm450_vm12, %v453_v18, %v456_v17 }
  0xf2   :  { %v458_v19 = vsel %vm448_vm13, nan, %v457_v3  ;;  %v230_v20 = vand.u32 2147483647, %v229_v10 }
  0xf3   :  { %462 = vst [vmem:[#allocation2 + $0x18] sm:$0xff] %v458_v19 }
  0xf4   :  { %v233_v43 = vmul.f32 %v232_v21, %v230_v20 }
  0xf6   :  { %v234_v25 = vxor.u32 2147483648, %v233_v43 }
  0xf8   :  { %v235_v61 = vsel %vm152_vm14, %v234_v25, %v233_v43 }
  0xf9   :  { %v238_v28 = vsel %vm151_vm15, %v619_v34, %v235_v61 }
  0xfa   :  { %536 = vcosq.f32 %v238_v28 }
  0xfb   :  { %538 = vsinq.f32 %v238_v28 }
 0x104   :  { %v537_v30 = vpop.eup %536 }
 0x105   :  { %v539_v32 = vpop.eup %538  ;;  %v249_v33 = vxor.u32 2147483648, %v537_v30 }
 0x106   :  { %v246_v8 = vxor.u32 2147483648, %v539_v32 }
 0x107   :  { %v250_v6 = vsel %vm248_vm0, %v249_v33, %v539_v32 }
 0x108   :  { %v247_v26 = vsel %vm245_vm1, %v537_v30, %v246_v8 }
 0x109   :  { %v251_v41 = vsel %vm244_vm2, %v247_v26, %v250_v6 }
 0x10a   :  { %v252_v45 = vsel %vm242_vm3, nan, %v251_v41 }
 0x10b   :  { %460 = vst [vmem:[#allocation2 + $0x8] sm:$0xff] %v252_v45 }
 0x10c   :  { %551 = shalt.err (!%p548_p4)
}
 0x10d   :  { %s552_s22 = scalar_lea.hbm %s916_s2, 512 }
 0x10e   :  { %p553_p5 = scmp.ne.s32.totalorder %s916_s2, %s552_s22  ;;  %p556_p6 = scmp.lt.u32.totalorder %s552_s22, %s916_s2 }
 0x110   :  { %p558_p7 = pnand %p556_p6, %p553_p5 }
 0x112   :  { %561 = shalt.err (!%p558_p7)
}
 0x113   :  { %s572_s27 = smov 128   ;;  %s573_s28 = smov 8  }
 0x114   :  { %474 = dma.vmem_to_hbm [thread:$0]  %s469_s1, 512, %s916_s2, [#allocation3], %s572_s27, %s572_s27, %s573_s28  }
 0x115   :  { %562 = dma.done.wait [#allocation3], 512  }
 0x116   :  { %563 = vsyncadd [#allocation3], 4294966784 }
 0x117   :  { %478 = vsyncpa [#allocation3], 1 }

</bundles_post_ra>
